<compile_context>
chip_gen: v7x
topology: tpu7x:2x2x1
jax: 0.10.0
libtpu: 0.0.40
codegen_flags: <defaults>
</compile_context>

<pallas_src>
import functools

import jax
import jax.numpy as jnp
from jax.experimental import pallas as pl
from jax.experimental.pallas import tpu as pltpu  # noqa: F401  (kept for TPU-specific tuning hooks)

NUM_ENT = 32
NUM_REL = 8
EMB_DIM = 48          # divisible by max_arity = 6 -> shifts of 8,16,24,32,40
MAX_ARITY = 6
BATCH = 16
DECAY = 0.01
OUT_LANES = 128       # lane-dense output row: lanes [0:B] = scores, lane B = reg_loss

# TODO(synk): hidden_drop (torch.nn.Dropout) is identity at inference; training-mode
#             dropout masking is not applied here.
# TODO(synk): the original `computer` convolutional propagation is unreleased upstream;
#             one normalized-adjacency propagation (graph1 @ E) stands in for it.


def _dot(a, b):
    return jnp.dot(a, b, preferred_element_type=jnp.float32)


def _dot_t(a, b):
    """a:(m,d), b:(n,d) -> (m,n) contracting the last (lane) dims of both (A @ B^T)."""
    return jax.lax.dot_general(a, b, (((1,), (1,)), ((), ())),
                               preferred_element_type=jnp.float32)


def _shift_perm(d, sh):
    """(d,d) permutation P with (v @ P)[:, j] == v[:, (j + sh) % d].

    Built from iota compares only (add / compare / select), so it lowers cleanly even
    though d=48 is not lane-aligned; the extra tiny matmul rides the idle MXU.
    """
    ri = jax.lax.broadcasted_iota(jnp.int32, (d, d), 0)
    ci = jax.lax.broadcasted_iota(jnp.int32, (d, d), 1)
    src = ci + sh
    src = jnp.where(src >= d, src - d, src)      # (ci + sh) % d without vector rem
    return (ri == src).astype(jnp.float32)


def _hgcn_fused_kernel(decay, batch, max_arity,
                       g_ref, e_ref, rw_ref, ridx_ref, eidx_ref, out_ref):
    n_ent, d = e_ref.shape
    n_rel = rw_ref.shape[0]
    b = batch

    # 1) GCN propagation: e_emb = graph1 @ E.weight  (single full-size MXU matmul)
    e_emb = _dot(g_ref[...], e_ref[...])                           # (N, D)

    # 2) gathers as one-hot matmuls
    ent_iota = jax.lax.broadcasted_iota(jnp.int32, (max_arity * b, n_ent), 1)
    onehot_e = (eidx_ref[...] == ent_iota).astype(jnp.float32)     # (6B, N)
    gathered = _dot(onehot_e, e_emb)                               # rows k*B:(k+1)*B = e_emb[e_idx[k]]

    rel_iota = jax.lax.broadcasted_iota(jnp.int32, (b, n_rel), 1)
    onehot_r = (ridx_ref[...] == rel_iota).astype(jnp.float32)     # (B, R)
    r = _dot(onehot_r, rw_ref[...])                                # (B, D) = R[r_idx]

    # 3) cyclic shifts (permutation matmuls) + 7-way elementwise product
    x = r * gathered[0:b, :]                                       # e1: no shift
    for k in range(1, max_arity):
        sh = (k * d) // max_arity
        ek = _dot(gathered[k * b:(k + 1) * b, :], _shift_perm(d, sh))
        x = x * ek
    # x = hidden_drop(x)  -> identity at inference (see TODO at top of file)

    # 4) scores, lane-oriented: scores[b] = sum_d x[b, d]
    ones_row = jnp.ones((1, d), jnp.float32)
    s_lane = _dot_t(ones_row, x)                                   # (1, B) along lanes

    # 5) L2 regularizer over the *raw* embeddings of e1..e4 (shared lane reduction)
    raw = _dot(onehot_e[0:4 * b, :], e_ref[...])                   # (4B, D) = E[e1..e4]
    sq_rows = jnp.sum(raw * raw, axis=1, keepdims=True)            # (4B, 1)
    reg = jnp.zeros((1, 1), jnp.float32)
    for k in range(4):
        reg = reg + jnp.sqrt(jnp.sum(sq_rows[k * b:(k + 1) * b, :], keepdims=True))
    reg = reg * decay                                              # (1, 1)

    # 6) single lane-dense (1, OUT_LANES) output: lanes [0:B] scores, lane B = reg
    out_w = out_ref.shape[1]
    sel = (jax.lax.broadcasted_iota(jnp.int32, (b, out_w), 0)
           == jax.lax.broadcasted_iota(jnp.int32, (b, out_w), 1)).astype(jnp.float32)
    lane = jax.lax.broadcasted_iota(jnp.int32, (1, out_w), 1)
    out_ref[...] = _dot(s_lane, sel) + jnp.where(lane == b, reg, jnp.float32(0.0))


def hgcn_forward(E_w, R_w, graph1, r_idx, e_idx, *, decay=DECAY):
    """r_idx: (B,) int32 relation indices; e_idx: (6, B) int32 entity indices."""
    b = r_idx.shape[0]
    assert e_idx.shape == (MAX_ARITY, b)
    assert b + 1 <= OUT_LANES

    ridx_col = r_idx.reshape(b, 1).astype(jnp.int32)               # (B, 1)
    eidx_col = e_idx.reshape(MAX_ARITY * b, 1).astype(jnp.int32)   # (6B, 1)

    kern = functools.partial(_hgcn_fused_kernel, float(decay), b, MAX_ARITY)
    out = pl.pallas_call(
        kern,
        out_shape=jax.ShapeDtypeStruct((1, OUT_LANES), jnp.float32),
    )(graph1, E_w, R_w, ridx_col, eidx_col)                        # whole-array VMEM blocks, no grid

    scores = out[0, :b]
    reg_loss = out[0, b]
    return scores, reg_loss


def hgcn_forward_ref(E_w, R_w, graph1, r_idx, e_idx, *, decay=DECAY):
    d = E_w.shape[1]
    r = R_w[r_idx]
    e_emb = graph1 @ E_w
    gathered = [e_emb[e_idx[k]] for k in range(MAX_ARITY)]

    def shift(v, sh):
        return jnp.concatenate([v[:, sh:], v[:, :sh]], axis=1)

    shifted = [gathered[0]] + [
        shift(gathered[k], (k * d) // MAX_ARITY) for k in range(1, MAX_ARITY)
    ]
    x = r
    for e in shifted:
        x = x * e
    scores = jnp.sum(x, axis=1)
    reg = decay * sum(jnp.linalg.norm(E_w[e_idx[k]]) for k in range(4))
    return scores, reg


if __name__ == "__main__":
    key = jax.random.PRNGKey(0)
    k_e, k_r, k_g, k_ridx, k_eidx = jax.random.split(key, 5)

    # Deterministic "xavier_normal_"-style init; row 0 forced to ones (HGCN.init()).
    std_e = (2.0 / (NUM_ENT + EMB_DIM)) ** 0.5
    std_r = (2.0 / (NUM_REL + EMB_DIM)) ** 0.5
    E_w = jax.random.normal(k_e, (NUM_ENT, EMB_DIM), jnp.float32) * std_e
    R_w = jax.random.normal(k_r, (NUM_REL, EMB_DIM), jnp.float32) * std_r
    E_w = E_w.at[0].set(jnp.ones((EMB_DIM,), jnp.float32))
    R_w = R_w.at[0].set(jnp.ones((EMB_DIM,), jnp.float32))

    # Synthetic normalized adjacency standing in for dataset.getSparseGraph(...).
    adj = (jax.random.uniform(k_g, (NUM_ENT, NUM_ENT)) < 0.2).astype(jnp.float32)
    adj = adj + jnp.eye(NUM_ENT, dtype=jnp.float32)
    graph1 = adj / jnp.sum(adj, axis=1, keepdims=True)

    r_idx = jax.random.randint(k_ridx, (BATCH,), 0, NUM_REL, jnp.int32)
    e_idx = jax.random.randint(k_eidx, (MAX_ARITY, BATCH), 0, NUM_ENT, jnp.int32)

    fwd = jax.jit(hgcn_forward)
    scores, reg_loss = fwd(E_w, R_w, graph1, r_idx, e_idx)
    scores = jax.block_until_ready(scores)
    reg_loss = jax.block_until_ready(reg_loss)

    # Sanity-check against a pure-JAX reference.
    scores_ref, reg_ref = hgcn_forward_ref(E_w, R_w, graph1, r_idx, e_idx)
    assert jnp.allclose(scores, scores_ref, rtol=1e-4, atol=1e-6), (
        float(jnp.max(jnp.abs(scores - scores_ref))))
    assert jnp.allclose(reg_loss, reg_ref, rtol=1e-4, atol=1e-6), (
        float(jnp.abs(reg_loss - reg_ref)))

    print("KERNEL_OK")
</pallas_src>

<mosaic_0001>
module attributes {stable_mosaic.version = 11 : i64} {
  func.func @_hgcn_fused_kernel(%arg0: memref<32x32xf32, #tpu.memory_space<vmem>>, %arg1: memref<32x48xf32, #tpu.memory_space<vmem>>, %arg2: memref<8x48xf32, #tpu.memory_space<vmem>>, %arg3: memref<16x1xi32, #tpu.memory_space<vmem>>, %arg4: memref<96x1xi32, #tpu.memory_space<vmem>>, %arg5: memref<1x128xf32, #tpu.memory_space<vmem>>) attributes {dimension_semantics = [], scalar_prefetch = 0 : i64, scratch_operands = 0 : i64, tpu.core_type = #tpu.core_type<tc>} {
    %c0 = arith.constant 0 : index
    %c0_0 = arith.constant 0 : index
    %0 = vector.load %arg0[%c0, %c0_0] : memref<32x32xf32, #tpu.memory_space<vmem>>, vector<32x32xf32>
    %c0_1 = arith.constant 0 : index
    %c0_2 = arith.constant 0 : index
    %1 = vector.load %arg1[%c0_1, %c0_2] : memref<32x48xf32, #tpu.memory_space<vmem>>, vector<32x48xf32>
    %cst = arith.constant dense<0.000000e+00> : vector<32x48xf32>
    %2 = tpu.matmul %0, %1, %cst {dimension_numbers = #tpu.dot_dimension_numbers<[1], [0], [0], [1], [0, 0, 1, 1], [], []>} : vector<32x32xf32>, vector<32x48xf32>, vector<32x48xf32> -> vector<32x48xf32>
    %3 = tpu.iota {dimensions = array<i32: 1>} : vector<96x32xi32>
    %c0_3 = arith.constant 0 : index
    %c0_4 = arith.constant 0 : index
    %4 = vector.load %arg4[%c0_3, %c0_4] : memref<96x1xi32, #tpu.memory_space<vmem>>, vector<96x1xi32>
    %5 = vector.broadcast %4 : vector<96x1xi32> to vector<96x32xi32>
    %6 = arith.cmpi eq, %5, %3 : vector<96x32xi32>
    %7 = arith.extui %6 : vector<96x32xi1> to vector<96x32xi32>
    %8 = arith.sitofp %7 : vector<96x32xi32> to vector<96x32xf32>
    %cst_5 = arith.constant dense<0.000000e+00> : vector<96x48xf32>
    %9 = tpu.matmul %8, %2, %cst_5 {dimension_numbers = #tpu.dot_dimension_numbers<[1], [0], [0], [1], [0, 0, 1, 1], [], []>} : vector<96x32xf32>, vector<32x48xf32>, vector<96x48xf32> -> vector<96x48xf32>
    %10 = tpu.iota {dimensions = array<i32: 1>} : vector<16x8xi32>
    %c0_6 = arith.constant 0 : index
    %c0_7 = arith.constant 0 : index
    %11 = vector.load %arg3[%c0_6, %c0_7] : memref<16x1xi32, #tpu.memory_space<vmem>>, vector<16x1xi32>
    %12 = vector.broadcast %11 : vector<16x1xi32> to vector<16x8xi32>
    %13 = arith.cmpi eq, %12, %10 : vector<16x8xi32>
    %14 = arith.extui %13 : vector<16x8xi1> to vector<16x8xi32>
    %15 = arith.sitofp %14 : vector<16x8xi32> to vector<16x8xf32>
    %c0_8 = arith.constant 0 : index
    %c0_9 = arith.constant 0 : index
    %16 = vector.load %arg2[%c0_8, %c0_9] : memref<8x48xf32, #tpu.memory_space<vmem>>, vector<8x48xf32>
    %cst_10 = arith.constant dense<0.000000e+00> : vector<16x48xf32>
    %17 = tpu.matmul %15, %16, %cst_10 {dimension_numbers = #tpu.dot_dimension_numbers<[1], [0], [0], [1], [0, 0, 1, 1], [], []>} : vector<16x8xf32>, vector<8x48xf32>, vector<16x48xf32> -> vector<16x48xf32>
    %18 = vector.extract_strided_slice %9 {offsets = [0, 0], sizes = [16, 48], strides = [1, 1]} : vector<96x48xf32> to vector<16x48xf32>
    %19 = arith.mulf %17, %18 : vector<16x48xf32>
    %20 = vector.extract_strided_slice %9 {offsets = [16, 0], sizes = [16, 48], strides = [1, 1]} : vector<96x48xf32> to vector<16x48xf32>
    %21 = tpu.iota {dimensions = array<i32: 0>} : vector<48x48xi32>
    %22 = tpu.iota {dimensions = array<i32: 1>} : vector<48x48xi32>
    %c8_i32 = arith.constant 8 : i32
    %23 = vector.broadcast %c8_i32 : i32 to vector<48x48xi32>
    %24 = arith.addi %22, %23 : vector<48x48xi32>
    %c48_i32 = arith.constant 48 : i32
    %25 = vector.broadcast %c48_i32 : i32 to vector<48x48xi32>
    %26 = arith.cmpi sge, %24, %25 : vector<48x48xi32>
    %c48_i32_11 = arith.constant 48 : i32
    %27 = vector.broadcast %c48_i32_11 : i32 to vector<48x48xi32>
    %28 = arith.subi %24, %27 : vector<48x48xi32>
    %29 = arith.select %26, %28, %24 : vector<48x48xi1>, vector<48x48xi32>
    %30 = arith.cmpi eq, %21, %29 : vector<48x48xi32>
    %31 = arith.extui %30 : vector<48x48xi1> to vector<48x48xi32>
    %32 = arith.sitofp %31 : vector<48x48xi32> to vector<48x48xf32>
    %cst_12 = arith.constant dense<0.000000e+00> : vector<16x48xf32>
    %33 = tpu.matmul %20, %32, %cst_12 {dimension_numbers = #tpu.dot_dimension_numbers<[1], [0], [0], [1], [0, 0, 1, 1], [], []>} : vector<16x48xf32>, vector<48x48xf32>, vector<16x48xf32> -> vector<16x48xf32>
    %34 = arith.mulf %19, %33 : vector<16x48xf32>
    %35 = vector.extract_strided_slice %9 {offsets = [32, 0], sizes = [16, 48], strides = [1, 1]} : vector<96x48xf32> to vector<16x48xf32>
    %36 = tpu.iota {dimensions = array<i32: 0>} : vector<48x48xi32>
    %37 = tpu.iota {dimensions = array<i32: 1>} : vector<48x48xi32>
    %c16_i32 = arith.constant 16 : i32
    %38 = vector.broadcast %c16_i32 : i32 to vector<48x48xi32>
    %39 = arith.addi %37, %38 : vector<48x48xi32>
    %c48_i32_13 = arith.constant 48 : i32
    %40 = vector.broadcast %c48_i32_13 : i32 to vector<48x48xi32>
    %41 = arith.cmpi sge, %39, %40 : vector<48x48xi32>
    %c48_i32_14 = arith.constant 48 : i32
    %42 = vector.broadcast %c48_i32_14 : i32 to vector<48x48xi32>
    %43 = arith.subi %39, %42 : vector<48x48xi32>
    %44 = arith.select %41, %43, %39 : vector<48x48xi1>, vector<48x48xi32>
    %45 = arith.cmpi eq, %36, %44 : vector<48x48xi32>
    %46 = arith.extui %45 : vector<48x48xi1> to vector<48x48xi32>
    %47 = arith.sitofp %46 : vector<48x48xi32> to vector<48x48xf32>
    %cst_15 = arith.constant dense<0.000000e+00> : vector<16x48xf32>
    %48 = tpu.matmul %35, %47, %cst_15 {dimension_numbers = #tpu.dot_dimension_numbers<[1], [0], [0], [1], [0, 0, 1, 1], [], []>} : vector<16x48xf32>, vector<48x48xf32>, vector<16x48xf32> -> vector<16x48xf32>
    %49 = arith.mulf %34, %48 : vector<16x48xf32>
    %50 = vector.extract_strided_slice %9 {offsets = [48, 0], sizes = [16, 48], strides = [1, 1]} : vector<96x48xf32> to vector<16x48xf32>
    %51 = tpu.iota {dimensions = array<i32: 0>} : vector<48x48xi32>
    %52 = tpu.iota {dimensions = array<i32: 1>} : vector<48x48xi32>
    %c24_i32 = arith.constant 24 : i32
    %53 = vector.broadcast %c24_i32 : i32 to vector<48x48xi32>
    %54 = arith.addi %52, %53 : vector<48x48xi32>
    %c48_i32_16 = arith.constant 48 : i32
    %55 = vector.broadcast %c48_i32_16 : i32 to vector<48x48xi32>
    %56 = arith.cmpi sge, %54, %55 : vector<48x48xi32>
    %c48_i32_17 = arith.constant 48 : i32
    %57 = vector.broadcast %c48_i32_17 : i32 to vector<48x48xi32>
    %58 = arith.subi %54, %57 : vector<48x48xi32>
    %59 = arith.select %56, %58, %54 : vector<48x48xi1>, vector<48x48xi32>
    %60 = arith.cmpi eq, %51, %59 : vector<48x48xi32>
    %61 = arith.extui %60 : vector<48x48xi1> to vector<48x48xi32>
    %62 = arith.sitofp %61 : vector<48x48xi32> to vector<48x48xf32>
    %cst_18 = arith.constant dense<0.000000e+00> : vector<16x48xf32>
    %63 = tpu.matmul %50, %62, %cst_18 {dimension_numbers = #tpu.dot_dimension_numbers<[1], [0], [0], [1], [0, 0, 1, 1], [], []>} : vector<16x48xf32>, vector<48x48xf32>, vector<16x48xf32> -> vector<16x48xf32>
    %64 = arith.mulf %49, %63 : vector<16x48xf32>
    %65 = vector.extract_strided_slice %9 {offsets = [64, 0], sizes = [16, 48], strides = [1, 1]} : vector<96x48xf32> to vector<16x48xf32>
    %66 = tpu.iota {dimensions = array<i32: 0>} : vector<48x48xi32>
    %67 = tpu.iota {dimensions = array<i32: 1>} : vector<48x48xi32>
    %c32_i32 = arith.constant 32 : i32
    %68 = vector.broadcast %c32_i32 : i32 to vector<48x48xi32>
    %69 = arith.addi %67, %68 : vector<48x48xi32>
    %c48_i32_19 = arith.constant 48 : i32
    %70 = vector.broadcast %c48_i32_19 : i32 to vector<48x48xi32>
    %71 = arith.cmpi sge, %69, %70 : vector<48x48xi32>
    %c48_i32_20 = arith.constant 48 : i32
    %72 = vector.broadcast %c48_i32_20 : i32 to vector<48x48xi32>
    %73 = arith.subi %69, %72 : vector<48x48xi32>
    %74 = arith.select %71, %73, %69 : vector<48x48xi1>, vector<48x48xi32>
    %75 = arith.cmpi eq, %66, %74 : vector<48x48xi32>
    %76 = arith.extui %75 : vector<48x48xi1> to vector<48x48xi32>
    %77 = arith.sitofp %76 : vector<48x48xi32> to vector<48x48xf32>
    %cst_21 = arith.constant dense<0.000000e+00> : vector<16x48xf32>
    %78 = tpu.matmul %65, %77, %cst_21 {dimension_numbers = #tpu.dot_dimension_numbers<[1], [0], [0], [1], [0, 0, 1, 1], [], []>} : vector<16x48xf32>, vector<48x48xf32>, vector<16x48xf32> -> vector<16x48xf32>
    %79 = arith.mulf %64, %78 : vector<16x48xf32>
    %80 = vector.extract_strided_slice %9 {offsets = [80, 0], sizes = [16, 48], strides = [1, 1]} : vector<96x48xf32> to vector<16x48xf32>
    %81 = tpu.iota {dimensions = array<i32: 0>} : vector<48x48xi32>
    %82 = tpu.iota {dimensions = array<i32: 1>} : vector<48x48xi32>
    %c40_i32 = arith.constant 40 : i32
    %83 = vector.broadcast %c40_i32 : i32 to vector<48x48xi32>
    %84 = arith.addi %82, %83 : vector<48x48xi32>
    %c48_i32_22 = arith.constant 48 : i32
    %85 = vector.broadcast %c48_i32_22 : i32 to vector<48x48xi32>
    %86 = arith.cmpi sge, %84, %85 : vector<48x48xi32>
    %c48_i32_23 = arith.constant 48 : i32
    %87 = vector.broadcast %c48_i32_23 : i32 to vector<48x48xi32>
    %88 = arith.subi %84, %87 : vector<48x48xi32>
    %89 = arith.select %86, %88, %84 : vector<48x48xi1>, vector<48x48xi32>
    %90 = arith.cmpi eq, %81, %89 : vector<48x48xi32>
    %91 = arith.extui %90 : vector<48x48xi1> to vector<48x48xi32>
    %92 = arith.sitofp %91 : vector<48x48xi32> to vector<48x48xf32>
    %cst_24 = arith.constant dense<0.000000e+00> : vector<16x48xf32>
    %93 = tpu.matmul %80, %92, %cst_24 {dimension_numbers = #tpu.dot_dimension_numbers<[1], [0], [0], [1], [0, 0, 1, 1], [], []>} : vector<16x48xf32>, vector<48x48xf32>, vector<16x48xf32> -> vector<16x48xf32>
    %94 = arith.mulf %79, %93 : vector<16x48xf32>
    %cst_25 = arith.constant 1.000000e+00 : f32
    %95 = vector.broadcast %cst_25 : f32 to vector<1x48xf32>
    %cst_26 = arith.constant dense<0.000000e+00> : vector<1x16xf32>
    %96 = tpu.matmul %95, %94, %cst_26 {dimension_numbers = #tpu.dot_dimension_numbers<[1], [1], [0], [0], [0, 0, 1, 0], [], []>} : vector<1x48xf32>, vector<16x48xf32>, vector<1x16xf32> -> vector<1x16xf32>
    %97 = vector.extract_strided_slice %8 {offsets = [0, 0], sizes = [64, 32], strides = [1, 1]} : vector<96x32xf32> to vector<64x32xf32>
    %c0_27 = arith.constant 0 : index
    %c0_28 = arith.constant 0 : index
    %98 = vector.load %arg1[%c0_27, %c0_28] : memref<32x48xf32, #tpu.memory_space<vmem>>, vector<32x48xf32>
    %cst_29 = arith.constant dense<0.000000e+00> : vector<64x48xf32>
    %99 = tpu.matmul %97, %98, %cst_29 {dimension_numbers = #tpu.dot_dimension_numbers<[1], [0], [0], [1], [0, 0, 1, 1], [], []>} : vector<64x32xf32>, vector<32x48xf32>, vector<64x48xf32> -> vector<64x48xf32>
    %100 = arith.mulf %99, %99 : vector<64x48xf32>
    %cst_30 = arith.constant dense<0.000000e+00> : vector<64xf32>
    %101 = vector.multi_reduction <add>, %100, %cst_30 [1] : vector<64x48xf32> to vector<64xf32>
    %102 = vector.shape_cast %101 : vector<64xf32> to vector<64x1xf32>
    %cst_31 = arith.constant 0.000000e+00 : f32
    %103 = vector.broadcast %cst_31 : f32 to vector<1x1xf32>
    %104 = vector.extract_strided_slice %102 {offsets = [0, 0], sizes = [16, 1], strides = [1, 1]} : vector<64x1xf32> to vector<16x1xf32>
    %105 = vector.shape_cast %104 : vector<16x1xf32> to vector<1x16x1xf32>
    %cst_32 = arith.constant dense<0.000000e+00> : vector<1xf32>
    %106 = vector.multi_reduction <add>, %105, %cst_32 [1, 2] : vector<1x16x1xf32> to vector<1xf32>
    %107 = vector.shape_cast %106 : vector<1xf32> to vector<1x1x1xf32>
    %108 = vector.extract %107[0, 0, 0] : f32 from vector<1x1x1xf32>
    %109 = vector.broadcast %108 : f32 to vector<1x1xf32>
    %110 = math.sqrt %109 : vector<1x1xf32>
    %111 = arith.addf %103, %110 : vector<1x1xf32>
    %112 = vector.extract_strided_slice %102 {offsets = [16, 0], sizes = [16, 1], strides = [1, 1]} : vector<64x1xf32> to vector<16x1xf32>
    %113 = vector.shape_cast %112 : vector<16x1xf32> to vector<1x16x1xf32>
    %cst_33 = arith.constant dense<0.000000e+00> : vector<1xf32>
    %114 = vector.multi_reduction <add>, %113, %cst_33 [1, 2] : vector<1x16x1xf32> to vector<1xf32>
    %115 = vector.shape_cast %114 : vector<1xf32> to vector<1x1x1xf32>
    %116 = vector.extract %115[0, 0, 0] : f32 from vector<1x1x1xf32>
    %117 = vector.broadcast %116 : f32 to vector<1x1xf32>
    %118 = math.sqrt %117 : vector<1x1xf32>
    %119 = arith.addf %111, %118 : vector<1x1xf32>
    %120 = vector.extract_strided_slice %102 {offsets = [32, 0], sizes = [16, 1], strides = [1, 1]} : vector<64x1xf32> to vector<16x1xf32>
    %121 = vector.shape_cast %120 : vector<16x1xf32> to vector<1x16x1xf32>
    %cst_34 = arith.constant dense<0.000000e+00> : vector<1xf32>
    %122 = vector.multi_reduction <add>, %121, %cst_34 [1, 2] : vector<1x16x1xf32> to vector<1xf32>
    %123 = vector.shape_cast %122 : vector<1xf32> to vector<1x1x1xf32>
    %124 = vector.extract %123[0, 0, 0] : f32 from vector<1x1x1xf32>
    %125 = vector.broadcast %124 : f32 to vector<1x1xf32>
    %126 = math.sqrt %125 : vector<1x1xf32>
    %127 = arith.addf %119, %126 : vector<1x1xf32>
    %128 = vector.extract_strided_slice %102 {offsets = [48, 0], sizes = [16, 1], strides = [1, 1]} : vector<64x1xf32> to vector<16x1xf32>
    %129 = vector.shape_cast %128 : vector<16x1xf32> to vector<1x16x1xf32>
    %cst_35 = arith.constant dense<0.000000e+00> : vector<1xf32>
    %130 = vector.multi_reduction <add>, %129, %cst_35 [1, 2] : vector<1x16x1xf32> to vector<1xf32>
    %131 = vector.shape_cast %130 : vector<1xf32> to vector<1x1x1xf32>
    %132 = vector.extract %131[0, 0, 0] : f32 from vector<1x1x1xf32>
    %133 = vector.broadcast %132 : f32 to vector<1x1xf32>
    %134 = math.sqrt %133 : vector<1x1xf32>
    %135 = arith.addf %127, %134 : vector<1x1xf32>
    %cst_36 = arith.constant 0.00999999977 : f32
    %136 = vector.broadcast %cst_36 : f32 to vector<1x1xf32>
    %137 = arith.mulf %135, %136 : vector<1x1xf32>
    %138 = tpu.iota {dimensions = array<i32: 0>} : vector<16x128xi32>
    %139 = tpu.iota {dimensions = array<i32: 1>} : vector<16x128xi32>
    %140 = arith.cmpi eq, %138, %139 : vector<16x128xi32>
    %141 = arith.extui %140 : vector<16x128xi1> to vector<16x128xi32>
    %142 = arith.sitofp %141 : vector<16x128xi32> to vector<16x128xf32>
    %143 = tpu.iota {dimensions = array<i32: 1>} : vector<1x128xi32>
    %cst_37 = arith.constant dense<0.000000e+00> : vector<1x128xf32>
    %144 = tpu.matmul %96, %142, %cst_37 {dimension_numbers = #tpu.dot_dimension_numbers<[1], [0], [0], [1], [0, 0, 1, 1], [], []>} : vector<1x16xf32>, vector<16x128xf32>, vector<1x128xf32> -> vector<1x128xf32>
    %c16_i32_38 = arith.constant 16 : i32
    %145 = vector.broadcast %c16_i32_38 : i32 to vector<1x128xi32>
    %146 = arith.cmpi eq, %143, %145 : vector<1x128xi32>
    %cst_39 = arith.constant 0.000000e+00 : f32
    %147 = vector.shape_cast %137 : vector<1x1xf32> to vector<1x1xf32>
    %148 = vector.broadcast %147 : vector<1x1xf32> to vector<1x128xf32>
    %149 = vector.broadcast %cst_39 : f32 to vector<1x128xf32>
    %150 = arith.select %146, %148, %149 : vector<1x128xi1>, vector<1x128xf32>
    %151 = arith.addf %144, %150 : vector<1x128xf32>
    %c0_40 = arith.constant 0 : index
    %c0_41 = arith.constant 0 : index
    %152 = vector.load %arg5[%c0_40, %c0_41] : memref<1x128xf32, #tpu.memory_space<vmem>>, vector<1x128xf32>
    tpu.vector_store %arg5[%c0_40, %c0_41], %151 {strides = array<i32>} : memref<1x128xf32, #tpu.memory_space<vmem>>, vector<1x128xf32>,
    return
  }
}

</mosaic_0001>

<bundles_post_ra>
// kernel: hgcn_forward.1
= control target key start
LH: loop header
LB: loop body
LE: loop exit
PB: predicated region body
PF: predicated region fallthrough
CT: control target
= control target key end

     0   :  { %vm28_vm0 = vcmask 261120   ;;  %v1871_v3 = vmov 0   ;;  %v126_v26 = vlaneseq  ;;  %v1872_v35 = vmov 0.0   ;;  %s2261_s1 = inlined_call_operand.vmem [shape: f32[32,48], index: 1, kind: input, shape index: {}]   ;;  %s2262_s0 = inlined_call_operand.vmem [shape: f32[32,32], index: 0, kind: input, shape index: {}]   ;;  %s2263_s4 = inlined_call_operand.vmem [shape: s32[96,1], index: 4, kind: input, shape index: {}]   ;;  %s2264_s3 = inlined_call_operand.vmem [shape: s32[16,1], index: 3, kind: input, shape index: {}]   ;;  %s2265_s2 = inlined_call_operand.vmem [shape: f32[8,48], index: 2, kind: input, shape index: {}]   ;;  %s2266_s5 = inlined_call_operand.vmem [shape: f32[1,128], index: 5, kind: output, shape index: {}]  }
   0x1   :  { %v24_v0 = vld [vmem:[%s2261_s1] sm:$0xff]  ;;  %v25_v1 = vld [vmem:[%s2261_s1 + $0x8] sm:$0xff]  ;;  %v26_v2 = vld [vmem:[%s2261_s1 + $0x10] sm:$0xff]  ;;  %1861 = vset.pattern.permute.xlu0 %v1871_v3  ;;  %1862 = vset.pattern.permute.xlu1 %v1871_v3  ;;  %v1873_v39 = vmov 1.0|1.0   ;;  %vm388_vm6 = vcmask 64512  }
   0x2   :  { %v1916_v4 = vpack.c.bf16 %v25_v1, %v24_v0  ;;  %v27_v5 = vld [vmem:[%s2261_s1 + $0x18] sm:$0xff]  ;;  %v20_v6 = vld [vmem:[%s2262_s0] sm:$0xff]  ;;  %v130_v9 = vld [vmem:[%s2263_s4 + $0x10] sm:$0xff]  ;;  %v1988_v27 = vand.u32 127, %v126_v26  ;;  %v1990_v28 = vshrl.u32 %v126_v26, 7 }
   0x3   :  { %v1924_v7 = vpack.c.bf16 %v27_v5, %v26_v2  ;;  %1610 = vmatprep.mubr.msk.f32.mxu1 %vm28_vm0, %v20_v6  ;;  %v128_v8 = vld [vmem:[%s2263_s4] sm:$0xff]  ;;  %147 = vperm.xlu1 %1862, %v130_v9   ;;  %v129_v10 = vld [vmem:[%s2263_s4 + $0x8] sm:$0xff]  ;;  %v131_v11 = vld [vmem:[%s2263_s4 + $0x18] sm:$0xff] }
   0x4   :  { %1757 = vmatprep.subr.bf16.mxu1 %v1916_v4  ;;  %141 = vperm.xlu0 %1861, %v128_v8   ;;  %v21_v12 = vld [vmem:[%s2262_s0 + $0x8] sm:$0xff]  ;;  %v132_v13 = vld [vmem:[%s2263_s4 + $0x20] sm:$0xff]  ;;  %v22_v14 = vld [vmem:[%s2262_s0 + $0x10] sm:$0xff]  ;;  %v479_v29 = vadd.s32 8, %v1988_v27  ;;  %v1994_v30 = vadd.s32 8, %v1990_v28  ;;  %v2020_v48 = vadd.s32 16, %v1990_v28 }
   0x5   :  { %1759 = vmatpush3.bf16.msra.mxu1 %v1916_v4  ;;  %v133_v15 = vld [vmem:[%s2263_s4 + $0x28] sm:$0xff]  ;;  %v23_v16 = vld [vmem:[%s2262_s0 + $0x18] sm:$0xff]  ;;  %v134_v17 = vld [vmem:[%s2263_s4 + $0x30] sm:$0xff]  ;;  %v2023_v49 = vadd.s32 24, %v1990_v28  ;;  %v585_v55 = vadd.s32 16, %v1988_v27 }
   0x6   :  { %1761 = vmatprep.subr.bf16.mxu1 %v1924_v7  ;;  %v135_v18 = vld [vmem:[%s2263_s4 + $0x38] sm:$0xff]  ;;  %v136_v19 = vld [vmem:[%s2263_s4 + $0x40] sm:$0xff]  ;;  %v137_v20 = vld [vmem:[%s2263_s4 + $0x48] sm:$0xff]  ;;  %vm480_vm1 = vcmp.ge.s32.totalorder %v479_v29, 48  ;;  %v1426_v31 = vadd.s32 4294967248, %v479_v29 }
   0x7   :  { %150 = vperm.xlu1 %1862, %v131_v11   ;;  %v138_v21 = vld [vmem:[%s2263_s4 + $0x50] sm:$0xff]  ;;  %v139_v22 = vld [vmem:[%s2263_s4 + $0x58] sm:$0xff]  ;;  %v373_v23 = vld [vmem:[%s2264_s3] sm:$0xff]  ;;  %v1441_v56 = vadd.s32 4294967248, %v585_v55  ;;  %vm586_vm12 = vcmp.ge.s32.totalorder %v585_v55, 48 }
   0x8   :  { %144 = vperm.xlu0 %1861, %v129_v10   ;;  %v374_v24 = vld [vmem:[%s2264_s3 + $0x8] sm:$0xff]  ;;  %v387_v25 = vld [vmem:[%s2265_s2] sm:$0xff]  ;;  %v1997_v34 = vsel %vm480_vm1, %v1426_v31, %v479_v29 }
   0x9   :  { %1763 = vmatpush3.bf16.msra.mxu1 %v1924_v7  ;;  %1642 = vmatprep.subr.mxu0 %v387_v25  ;;  %vm483_vm3 = vcmp.eq.s32.totalorder %v1990_v28, %v1997_v34  ;;  %vm484_vm4 = vcmp.eq.s32.totalorder %v1994_v30, %v1997_v34  ;;  %vm485_vm7 = vcmp.eq.s32.totalorder %v2020_v48, %v1997_v34 }
   0xa   :  { %1643 = vmatpush3.msra.mxu0 %v387_v25  ;;  %vm2008_vm5 = vmpackc.low %vm484_vm4, %vm483_vm3  ;;  %vm486_vm8 = vcmp.eq.s32.totalorder %v2023_v49, %v1997_v34  ;;  %v2041_v59 = vsel %vm586_vm12, %v1441_v56, %v585_v55 }
   0xb   :  { %156 = vperm.xlu1 %1862, %v133_v15   ;;  %1773 = vmatprep.subr.msk.bf16.mxu0 %vm2008_vm5, %v1873_v39  ;;  %vm1776_vm11 = vmpackc.low %vm486_vm8, %vm485_vm7  ;;  %vm589_vm13 = vcmp.eq.s32.totalorder %v1990_v28, %v2041_v59  ;;  %vm590_vm14 = vcmp.eq.s32.totalorder %v1994_v30, %v2041_v59  ;;  %v690_v15 = vadd.s32 24, %v1988_v27  ;;  %vm591_vm12 = vcmp.eq.s32.totalorder %v2020_v48, %v2041_v59 }
   0xc   :  { %1611 = vmatmul.mubr.msk.f32.vlgmr.msra.gmra.mrb[0].mxu1 %vm28_vm0, %v21_v12  ;;  %153 = vperm.xlu0 %1861, %v132_v13   ;;  %vm1784_vm1 = vmpackc.low %vm590_vm14, %vm589_vm13  ;;  %v477_v13 = vadd.s32 32, %v1990_v28  ;;  %vm592_vm13 = vcmp.eq.s32.totalorder %v2023_v49, %v2041_v59 }
   0xd   :  { %1613 = vmatprep.mubr.msk.f32.mxu1 %vm28_vm0, %v22_v14  ;;  %v478_v14 = vadd.s32 40, %v1990_v28 }
   0xe   :  { %vm487_vm14 = vcmp.eq.s32.totalorder %v477_v13, %v1997_v34 }
   0xf   :  { %162 = vperm.xlu1 %1862, %v135_v18   ;;  %v795_v18 = vadd.s32 32, %v1988_v27 }
  0x10   :  { %1614 = vmatmul.mubr.msk.f32.gmra.mrb[2].mxu1 %vm28_vm0, %v23_v16  ;;  %159 = vperm.xlu0 %1861, %v134_v17   ;;  %v1456_v16 = vadd.s32 4294967248, %v690_v15 }
  0x13   :  { %168 = vperm.xlu1 %1862, %v137_v20   ;;  %v1471_v20 = vadd.s32 4294967248, %v795_v18 }
  0x14   :  { %165 = vperm.xlu0 %1861, %v136_v19  }
  0x17   :  { %174 = vperm.xlu1 %1862, %v139_v22  }
  0x18   :  { %171 = vperm.xlu0 %1861, %v138_v21  }
  0x1b   :  { %379 = vperm.xlu1 %1862, %v374_v24   ;;  %v900_v24 = vadd.s32 40, %v1988_v27 }
  0x1c   :  { %376 = vperm.xlu0 %1861, %v373_v23  }
  0x1d   :  { %v1486_v26 = vadd.s32 4294967248, %v900_v24 }
  0x82   :  { %v148_v33 = vpop.permute.xlu1 %147 }
  0x83   :  { %v142_v32 = vpop.permute.xlu0 %141  ;;  %vm178_vm15 = vcmp.eq.s32.totalorder %v148_v33, %v1988_v27 }
  0x84   :  { %vm176_vm2 = vcmp.eq.s32.totalorder %v142_v32, %v1988_v27  ;;  %v2050_v0 = vsel %vm178_vm15, 1.0, %v1872_v35  ;;  %vm488_vm15 = vcmp.eq.s32.totalorder %v478_v14, %v1997_v34 }
  0x85   :  { %v2000_v36 = vsel %vm176_vm2, 1.0, %v1872_v35 }
  0x86   :  { %1624 = vmatprep.mubr.msk.f32.mxu1 %vm28_vm0, %v2000_v36  ;;  %v151_v40 = vpop.permute.xlu1 %150 }
  0x87   :  { %v145_v38 = vpop.permute.xlu0 %144  ;;  %vm179_vm3 = vcmp.eq.s32.totalorder %v151_v40, %v1988_v27 }
  0x88   :  { %vm177_vm2 = vcmp.eq.s32.totalorder %v145_v38, %v1988_v27  ;;  %v2064_v2 = vsel %vm179_vm3, 1.0, %v1872_v35  ;;  %vm691_vm3 = vcmp.ge.s32.totalorder %v690_v15, 48 }
  0x89   :  { %v2054_v1 = vsel %vm177_vm2, 1.0, %v1872_v35  ;;  %vm1780_vm2 = vmpackc.low %vm488_vm15, %vm487_vm14  ;;  %v693_v17 = vsel %vm691_vm3, %v1456_v16, %v690_v15  ;;  %v1876_v15 = vmov 1.0  }
  0x8a   :  { %v157_v42 = vpop.permute.xlu1 %156  ;;  %vm698_vm14 = vcmp.eq.s32.totalorder %v477_v13, %v693_v17  ;;  %vm699_vm15 = vcmp.eq.s32.totalorder %v478_v14, %v693_v17 }
  0x8b   :  { %v154_v41 = vpop.permute.xlu0 %153 }
  0x8c   :  { %vm180_vm4 = vcmp.eq.s32.totalorder %v154_v41, %v1988_v27 }
  0x8d   :  { %v2067_v3 = vsel %vm180_vm4, 1.0, %v1872_v35  ;;  %vm593_vm4 = vcmp.eq.s32.totalorder %v477_v13, %v2041_v59 }
  0x8e   :  { %v163_v44 = vpop.permute.xlu1 %162 }
  0x8f   :  { %v160_v43 = vpop.permute.xlu0 %159  ;;  %vm183_vm7 = vcmp.eq.s32.totalorder %v163_v44, %v1988_v27 }
  0x90   :  { %v2088_v8 = vsel %vm183_vm7, 1.0, %v1872_v35  ;;  %vm695_vm7 = vcmp.eq.s32.totalorder %v1994_v30, %v693_v17 }
  0x92   :  { %v2015_v46 = vpop.permute.xlu1 %168 }
  0x93   :  { %v166_v45 = vpop.permute.xlu0 %165 }
  0x94   :  { %vm184_vm8 = vcmp.eq.s32.totalorder %v166_v45, %v1988_v27 }
  0x95   :  { %v1406_v9 = vsel %vm184_vm8, 1.0, %v1872_v35 }
  0x96   :  { %v2025_v50 = vpop.permute.xlu1 %174 }
  0x97   :  { %v2017_v47 = vpop.permute.xlu0 %171 }
  0x9a   :  { %v380_v52 = vpop.permute.xlu1 %379 }
  0x9b   :  { %v377_v51 = vpop.permute.xlu0 %376  ;;  %vm382_vm10 = vcmp.eq.s32.totalorder %v380_v52, %v1988_v27 }
  0x9c   :  { %vm381_vm9 = vcmp.eq.s32.totalorder %v377_v51, %v1988_v27  ;;  %v1423_v54 = vsel %vm382_vm10, 1.0, %v1872_v35  ;;  %vm186_vm10 = vcmp.eq.s32.totalorder %v2017_v47, %v1988_v27 }
  0x9d   :  { %v1422_v53 = vsel %vm381_vm9, 1.0, %v1872_v35  ;;  %vm185_vm9 = vcmp.eq.s32.totalorder %v2015_v46, %v1988_v27  ;;  %v1408_v11 = vsel %vm186_vm10, 1.0, %v1872_v35  ;;  %vm796_vm10 = vcmp.ge.s32.totalorder %v795_v18, 48 }
  0x9e   :  { %1644 = vmatprep.mubr.msk.f32.mxu0 %vm388_vm6, %v1422_v53  ;;  %v1407_v10 = vsel %vm185_vm9, 1.0, %v1872_v35  ;;  %v798_v21 = vsel %vm796_vm10, %v1471_v20, %v795_v18  ;;  %vm501_vm10 = vcmask 392192  }
  0x9f   :  { %1645 = vmatmul.mubr.msk.f32.vlgmr.msra.gmra.mrb[0].mxu0 %vm388_vm6, %v1423_v54  ;;  %vm182_vm6 = vcmp.eq.s32.totalorder %v160_v43, %v1988_v27  ;;  %vm804_vm3 = vcmp.eq.s32.totalorder %v478_v14, %v798_v21 }
  0xa0   :  { %1775 = vmatpush3.bf16.msk.msra.mxu0 %vm2008_vm5, %v1873_v39  ;;  %vm181_vm5 = vcmp.eq.s32.totalorder %v157_v42, %v1988_v27  ;;  %v2079_v6 = vsel %vm182_vm6, 1.0, %v1872_v35  ;;  %vm694_vm6 = vcmp.eq.s32.totalorder %v1990_v28, %v693_v17 }
  0xa1   :  { %1777 = vmatprep.subr.msk.bf16.mxu0 %vm1776_vm11, %v1873_v39  ;;  %v2076_v5 = vsel %vm181_vm5, 1.0, %v1872_v35  ;;  %vm594_vm5 = vcmp.eq.s32.totalorder %v478_v14, %v2041_v59  ;;  %vm2125_vm9 = vmpackc.low %vm695_vm7, %vm694_vm6 }
  0xa2   :  { %vm1792_vm8 = vmpackc.low %vm594_vm5, %vm593_vm4  ;;  %vm901_vm5 = vcmp.ge.s32.totalorder %v900_v24, 48 }
  0xa3   :  { %v903_v29 = vsel %vm901_vm5, %v1486_v26, %v900_v24 }
  0xa4   :  { %1779 = vmatpush3.bf16.msk.msra.mxu0 %vm1776_vm11, %v1873_v39  ;;  %vm187_vm11 = vcmp.eq.s32.totalorder %v2025_v50, %v1988_v27  ;;  %vm908_vm6 = vcmp.eq.s32.totalorder %v477_v13, %v903_v29  ;;  %vm909_vm7 = vcmp.eq.s32.totalorder %v478_v14, %v903_v29  ;;  %vm904_vm5 = vcmp.eq.s32.totalorder %v1990_v28, %v903_v29 }
  0xa5   :  { %v1409_v12 = vsel %vm187_vm11, 1.0, %v1872_v35  ;;  %1781 = vmatprep.subr.msk.bf16.mxu0 %vm1780_vm2, %v1873_v39  ;;  %vm799_vm11 = vcmp.eq.s32.totalorder %v1990_v28, %v798_v21 }
  0xa8   :  { %1783 = vmatpush3.bf16.msk.msra.mxu0 %vm1780_vm2, %v1873_v39  ;;  %vm803_vm2 = vcmp.eq.s32.totalorder %v477_v13, %v798_v21 }
  0xa9   :  { %1797 = vmatprep.subr.msk.bf16.mxu0 %vm2125_vm9, %v1873_v39  ;;  %vm2147_vm4 = vmpackc.low %vm804_vm3, %vm803_vm2  ;;  %vm802_vm2 = vcmp.eq.s32.totalorder %v2023_v49, %v798_v21 }
  0xdf   :  { %v1612_v57 = vpop.f32.mrb[0].mxu1 }
  0xe0   :  { %v107_v58 = vpop.f32.mrb[1].mxu1 }
  0xe1   :  { %v1764_v60 = vpack.c.bf16 %v1612_v57, %v107_v58 }
  0xe3   :  { %v1615_v61 = vpop.f32.mrb[2].mxu1  ;;  %1765 = vmatprep.subr.bf16.mxu1 %v1764_v60 }
  0xe4   :  { %v117_v62 = vpop.f32.mrb[3].mxu1  ;;  %1767 = vmatpush3.bf16.msra.mxu1 %v1764_v60 }
  0xe5   :  { %v1768_v63 = vpack.c.bf16 %v1615_v61, %v117_v62 }
  0xe7   :  { %1769 = vmatprep.subr.bf16.mxu1 %v1768_v63 }
  0xe8   :  { %1771 = vmatpush3.bf16.msra.mxu1 %v1768_v63 }
  0xe9   :  { %1785 = vmatprep.subr.msk.bf16.mxu1 %vm1784_vm1, %v1873_v39 }
  0xeb   :  { %1625 = vmatmul.mubr.msk.f32.vlgmr.msra.gmra.mrb[4].mxu1 %vm28_vm0, %v2054_v1 }
  0xec   :  { %1627 = vmatprep.mubr.msk.f32.mxu1 %vm28_vm0, %v2050_v0  ;;  %1787 = vmatpush3.bf16.msk.msra.mxu1 %vm1784_vm1, %v1873_v39  ;;  %vm1788_vm1 = vmpackc.low %vm592_vm13, %vm591_vm12  ;;  %vm800_vm12 = vcmp.eq.s32.totalorder %v1994_v30, %v798_v21 }
  0xed   :  { %1789 = vmatprep.subr.msk.bf16.mxu1 %vm1788_vm1, %v1873_v39  ;;  %vm2135_vm13 = vmpackc.low %vm800_vm12, %vm799_vm11  ;;  %vm696_vm11 = vcmp.eq.s32.totalorder %v2020_v48, %v693_v17  ;;  %vm697_vm12 = vcmp.eq.s32.totalorder %v2023_v49, %v693_v17 }
  0xef   :  { %1628 = vmatmul.mubr.msk.f32.gmra.mrb[6].mxu1 %vm28_vm0, %v2064_v2 }
  0xf0   :  { %1630 = vmatprep.mubr.msk.f32.mxu1 %vm28_vm0, %v2067_v3  ;;  %1791 = vmatpush3.bf16.msk.msra.mxu1 %vm1788_vm1, %v1873_v39  ;;  %vm2142_vm1 = vmpackc.low %vm699_vm15, %vm698_vm14  ;;  %vm801_vm15 = vcmp.eq.s32.totalorder %v2020_v48, %v798_v21 }
  0xf1   :  { %1793 = vmatprep.subr.msk.bf16.mxu1 %vm1792_vm8, %v1873_v39  ;;  %vm1800_vm14 = vmpackc.low %vm697_vm12, %vm696_vm11  ;;  %vm907_vm11 = vcmp.eq.s32.totalorder %v2023_v49, %v903_v29 }
  0xf2   :  { %vm1812_vm3 = vmpackc.low %vm802_vm2, %vm801_vm15 }
  0xf3   :  { %1631 = vmatmul.mubr.msk.f32.gmra.mrb[8].mxu1 %vm28_vm0, %v2076_v5 }
  0xf4   :  { %1633 = vmatprep.mubr.msk.f32.mxu1 %vm28_vm0, %v2079_v6  ;;  %1795 = vmatpush3.bf16.msk.msra.mxu1 %vm1792_vm8, %v1873_v39  ;;  %vm2151_vm8 = vmpackc.low %vm909_vm7, %vm908_vm6  ;;  %vm905_vm6 = vcmp.eq.s32.totalorder %v1994_v30, %v903_v29  ;;  %vm906_vm7 = vcmp.eq.s32.totalorder %v2020_v48, %v903_v29 }
  0xf5   :  { %1809 = vmatprep.subr.msk.bf16.mxu1 %vm2135_vm13, %v1873_v39 }
  0xf7   :  { %1634 = vmatmul.mubr.msk.f32.gmra.mrb[10].mxu1 %vm28_vm0, %v2088_v8 }
  0xf8   :  { %1636 = vmatprep.mubr.msk.f32.mxu1 %vm28_vm0, %v1406_v9 }
  0xfb   :  { %1637 = vmatmul.mubr.msk.f32.gmra.mrb[12].mxu1 %vm28_vm0, %v1407_v10 }
  0xfc   :  { %1639 = vmatprep.mubr.msk.f32.mxu1 %vm28_vm0, %v1408_v11 }
  0xff   :  { %1640 = vmatmul.mubr.msk.f32.gmra.mrb[14].mxu1 %vm28_vm0, %v1409_v12 }
 0x172   :  { %v1646_v32 = vpop.f32.mrb[0].mxu0 }
 0x173   :  { %v461_v33 = vpop.f32.mrb[1].mxu0 }
 0x1be   :  { %v1626_v34 = vpop.f32.mrb[4].mxu1 }
 0x1bf   :  { %v2155_v37 = vmul.f32 %v1646_v32, %v1626_v34  ;;  %v314_v38 = vpop.f32.mrb[5].mxu1 }
 0x1c0   :  { %v2157_v40 = vmul.f32 %v461_v33, %v314_v38 }
 0x1c2   :  { %v1629_v41 = vpop.f32.mrb[6].mxu1 }
 0x1c3   :  { %v324_v42 = vpop.f32.mrb[7].mxu1 }
 0x1c4   :  { %1659 = vmatprep.mubr.msk.f32.mxu0 %vm501_vm10, %v324_v42 }
 0x1c5   :  { %1660 = vmatmul.mubr.msk.f32.vlgmr.msra.gmra.mrb[2].mxu0 %vm501_vm10, %v1629_v41 }
 0x1c6   :  { %1799 = vmatpush3.bf16.msk.msra.mxu0 %vm2125_vm9, %v1873_v39  ;;  %v1632_v43 = vpop.f32.mrb[8].mxu1  ;;  %vm1820_vm9 = vmpackc.low %vm905_vm6, %vm904_vm5 }
 0x1c7   :  { %v334_v44 = vpop.f32.mrb[9].mxu1  ;;  %1801 = vmatprep.subr.msk.bf16.mxu0 %vm1800_vm14, %v1873_v39 }
 0x1c8   :  { %1674 = vmatprep.mubr.msk.f32.mxu1 %vm501_vm10, %v334_v44 }
 0x1c9   :  { %1675 = vmatmul.mubr.msk.f32.vlgmr.msra.gmra.mrb[16].mxu1 %vm501_vm10, %v1632_v43 }
 0x1ca   :  { %1803 = vmatpush3.bf16.msk.msra.mxu0 %vm1800_vm14, %v1873_v39  ;;  %1811 = vmatpush3.bf16.msk.msra.mxu1 %vm2135_vm13, %v1873_v39  ;;  %v1635_v45 = vpop.f32.mrb[10].mxu1  ;;  %vm1824_vm13 = vmpackc.low %vm907_vm11, %vm906_vm7  ;;  %vm1221_vm14 = vcmask 7168  }
 0x1cb   :  { %v344_v46 = vpop.f32.mrb[11].mxu1  ;;  %1805 = vmatprep.subr.msk.bf16.mxu0 %vm2142_vm1, %v1873_v39  ;;  %1813 = vmatprep.subr.msk.bf16.mxu1 %vm1812_vm3, %v1873_v39 }
 0x1cc   :  { %1689 = vmatprep.mubr.msk.f32.mxu0 %vm501_vm10, %v344_v46 }
 0x1ce   :  { %1807 = vmatpush3.bf16.msk.msra.mxu0 %vm2142_vm1, %v1873_v39  ;;  %1815 = vmatpush3.bf16.msk.msra.mxu1 %vm1812_vm3, %v1873_v39  ;;  %v1638_v47 = vpop.f32.mrb[12].mxu1  ;;  %vm1875_vm1 = vmmov 0  }
 0x1cf   :  { %v354_v50 = vpop.f32.mrb[13].mxu1  ;;  %1817 = vmatprep.subr.msk.bf16.mxu1 %vm2147_vm4, %v1873_v39  ;;  %1821 = vmatprep.subr.msk.bf16.mxu0 %vm1820_vm9, %v1873_v39 }
 0x1d0   :  { %1704 = vmatprep.mubr.msk.f32.mxu1 %vm501_vm10, %v354_v50 }
 0x1d1   :  { %1690 = vmatmul.mubr.msk.f32.vlgmr.msra.gmra.mrb[4].mxu0 %vm501_vm10, %v1635_v45 }
 0x1d2   :  { %1819 = vmatpush3.bf16.msk.msra.mxu1 %vm2147_vm4, %v1873_v39  ;;  %1823 = vmatpush3.bf16.msk.msra.mxu0 %vm1820_vm9, %v1873_v39  ;;  %v1641_v48 = vpop.f32.mrb[14].mxu1  ;;  %vm1307_vm4 = vcmp.eq.s32.totalorder %v1990_v28, %v1988_v27 }
 0x1d3   :  { %v364_v49 = vpop.f32.mrb[15].mxu1  ;;  %1825 = vmatprep.subr.msk.bf16.mxu0 %vm1824_vm13, %v1873_v39 }
 0x1d4   :  { %1719 = vmatprep.mubr.msk.f32.mxu0 %vm501_vm10, %v364_v49 }
 0x1d5   :  { %1705 = vmatmul.mubr.msk.f32.vlgmr.msra.gmra.mrb[18].mxu1 %vm501_vm10, %v1638_v47 }
 0x1d6   :  { %1827 = vmatpush3.bf16.msk.msra.mxu0 %vm1824_vm13, %v1873_v39  ;;  %1726 = vmatprep.mubr.msk.f32.mxu1 %vm1875_vm1, %v1872_v35  ;;  %vm1313_vm13 = vcmp.eq.s32.totalorder %v1988_v27, 16 }
 0x1d7   :  { %1829 = vmatprep.subr.msk.bf16.mxu0 %vm2151_vm8, %v1873_v39 }
 0x1da   :  { %1831 = vmatpush3.bf16.msk.msra.mxu0 %vm2151_vm8, %v1873_v39  ;;  %vm1308_vm8 = vcmp.eq.s32.totalorder %v1994_v30, %v1988_v27 }
 0x1db   :  { %1837 = vmatprep.subr.bf16.mxu0 %v1916_v4  ;;  %vm1845_vm12 = vmpackc.low %vm1308_vm8, %vm1307_vm4 }
 0x1dd   :  { %1720 = vmatmul.mubr.msk.f32.vlgmr.msra.gmra.mrb[6].mxu0 %vm501_vm10, %v1641_v48 }
 0x1de   :  { %1839 = vmatpush3.bf16.msra.mxu0 %v1916_v4  ;;  %1737 = vmatprep.mubr.msk.f32.mxu0 %vm28_vm0, %v2000_v36  ;;  %v1874_v4 = vmov 0.0|0.0  }
 0x1df   :  { %1841 = vmatprep.subr.bf16.mxu0 %v1924_v7  ;;  %1832 = vmatprep.subr.bf16.mxu1 %v1874_v4 }
 0x1e2   :  { %1843 = vmatpush3.bf16.msra.mxu0 %v1924_v7 }
 0x1e3   :  { %1844 = vmatprep.subr.bf16.mxu0 %v1874_v4 }
 0x1e5   :  { %1738 = vmatmul.mubr.msk.f32.vlgmr.msra.gmra.mrb[8].mxu0 %vm28_vm0, %v2054_v1 }
 0x1e6   :  { %1740 = vmatprep.mubr.msk.f32.mxu0 %vm28_vm0, %v2050_v0  ;;  %1846 = vmatpush3.bf16.msk.msra.mxu0 %vm1845_vm12, %v1873_v39 }
 0x1e9   :  { %1741 = vmatmul.mubr.msk.f32.gmra.mrb[10].mxu0 %vm28_vm0, %v2064_v2 }
 0x1ea   :  { %1743 = vmatprep.mubr.msk.f32.mxu0 %vm28_vm0, %v2067_v3 }
 0x1ed   :  { %1744 = vmatmul.mubr.msk.f32.gmra.mrb[12].mxu0 %vm28_vm0, %v2076_v5 }
 0x1ee   :  { %1746 = vmatprep.mubr.msk.f32.mxu0 %vm28_vm0, %v2079_v6 }
 0x1f1   :  { %1747 = vmatmul.mubr.msk.f32.gmra.mrb[14].mxu0 %vm28_vm0, %v2088_v8  ;;  %vm1834_vm0 = vmpackc.low %vm501_vm10, %vm501_vm10 }
 0x1f2   :  { %1753 = vmatprep.mubr.msk.f32.mxu0 %vm1875_vm1, %v1872_v35 }
 0x298   :  { %v1661_v7 = vpop.f32.mrb[2].mxu0 }
 0x299   :  { %v584_v36 = vmul.f32 %v1661_v7, %v2155_v37  ;;  %v574_v51 = vpop.f32.mrb[3].mxu0 }
 0x29a   :  { %v583_v52 = vmul.f32 %v574_v51, %v2157_v40 }
 0x29c   :  { %v1676_v53 = vpop.f32.mrb[16].mxu1 }
 0x29d   :  { %v689_v54 = vmul.f32 %v1676_v53, %v584_v36  ;;  %v679_v55 = vpop.f32.mrb[17].mxu1 }
 0x29e   :  { %v688_v56 = vmul.f32 %v679_v55, %v583_v52 }
 0x2a4   :  { %v1691_v57 = vpop.f32.mrb[4].mxu0 }
 0x2a5   :  { %v794_v58 = vmul.f32 %v1691_v57, %v689_v54  ;;  %v784_v59 = vpop.f32.mrb[5].mxu0 }
 0x2a6   :  { %v793_v60 = vmul.f32 %v784_v59, %v688_v56 }
 0x2a8   :  { %v1706_v61 = vpop.f32.mrb[18].mxu1 }
 0x2a9   :  { %v899_v62 = vmul.f32 %v1706_v61, %v794_v58  ;;  %v889_v63 = vpop.f32.mrb[19].mxu1 }
 0x2aa   :  { %v898_v0 = vmul.f32 %v889_v63, %v793_v60 }
 0x2b0   :  { %v1721_v1 = vpop.f32.mrb[6].mxu0 }
 0x2b1   :  { %v1004_v35 = vmul.f32 %v1721_v1, %v899_v62  ;;  %v994_v2 = vpop.f32.mrb[7].mxu0 }
 0x2b2   :  { %v1003_v3 = vmul.f32 %v994_v2, %v898_v0 }
 0x2b4   :  { %v1833_v5 = vpack.c.bf16 %v1004_v35, %v1003_v3 }
 0x2b6   :  { %1835 = vmatpush3.bf16.xpose.msk.msra.mxu1 %vm1834_vm0, %v1833_v5 }
 0x2b8   :  { %v1739_v6 = vpop.f32.mrb[8].mxu0 }
 0x2b9   :  { %v1190_v8 = vmul.f32 %v1739_v6, %v1739_v6  ;;  %v1150_v9 = vpop.f32.mrb[9].mxu0 }
 0x2ba   :  { %v1189_v10 = vmul.f32 %v1150_v9, %v1150_v9 }
 0x2bb   :  { %v1200_v11 = vsel %vm501_vm10, %v1190_v8, 0.0 }
 0x2bc   :  { %1201 = vadd.xlane.f32.xlu1 %v1200_v11  ;;  %v1742_v12 = vpop.f32.mrb[10].mxu0  ;;  %v1197_v13 = vsel %vm501_vm10, %v1189_v10, 0.0 }
 0x2bd   :  { %v1192_v14 = vmul.f32 %v1742_v12, %v1742_v12  ;;  %1198 = vadd.xlane.f32.xlu0 %v1197_v13  ;;  %1727 = vmatmul.mubr.msk.f32.vlgmr.msra.gmra.mrb[20].mxu1 %vm501_vm10, %v1876_v15  ;;  %v1160_v16 = vpop.f32.mrb[11].mxu0 }
 0x2be   :  { %v1191_v18 = vmul.f32 %v1160_v16, %v1160_v16 }
 0x2bf   :  { %v1206_v17 = vsel %vm501_vm10, %v1192_v14, 0.0 }
 0x2c0   :  { %v1745_v19 = vpop.f32.mrb[12].mxu0  ;;  %v1203_v24 = vsel %vm501_vm10, %v1191_v18, 0.0 }
 0x2c1   :  { %1207 = vadd.xlane.f32.xlu0 %v1206_v17  ;;  %v1170_v20 = vpop.f32.mrb[13].mxu0  ;;  %v1194_v22 = vmul.f32 %v1745_v19, %v1745_v19 }
 0x2c2   :  { %v1193_v21 = vmul.f32 %v1170_v20, %v1170_v20 }
 0x2c3   :  { %v1212_v32 = vsel %vm501_vm10, %v1194_v22, 0.0 }
 0x2c4   :  { %v1748_v23 = vpop.f32.mrb[14].mxu0  ;;  %v1209_v25 = vsel %vm501_vm10, %v1193_v21, 0.0 }
 0x2c5   :  { %1204 = vadd.xlane.f32.xlu0 %v1203_v24  ;;  %1210 = vadd.xlane.f32.xlu1 %v1209_v25  ;;  %v1180_v26 = vpop.f32.mrb[15].mxu0  ;;  %v1196_v31 = vmul.f32 %v1748_v23, %v1748_v23 }
 0x2c6   :  { %v1195_v29 = vmul.f32 %v1180_v26, %v1180_v26 }
 0x2c7   :  { %v1218_v34 = vsel %vm501_vm10, %v1196_v31, 0.0 }
 0x2c8   :  { %v1215_v33 = vsel %vm501_vm10, %v1195_v29, 0.0  ;;  %vm1315_vm10 = vcmask 130048  }
 0x2c9   :  { %1213 = vadd.xlane.f32.xlu0 %v1212_v32  ;;  %1216 = vadd.xlane.f32.xlu1 %v1215_v33 }
 0x2cd   :  { %1219 = vadd.xlane.f32.xlu0 %v1218_v34 }
 0x349   :  { %v1202_v37 = vpop.xlane.xlu1 %1201 }
 0x34a   :  { %v1223_v38 = vsel %vm1221_vm14, %v1202_v37, 0.0  ;;  %v1199_v40 = vpop.xlane.xlu0 %1198 }
 0x34b   :  { %v1222_v41 = vsel %vm1221_vm14, %v1199_v40, 0.0 }
 0x34c   :  { %v1224_v42 = vadd.f32 %v1223_v38, %v1222_v41 }
 0x34e   :  { %v1208_v43 = vpop.xlane.xlu0 %1207  ;;  %1225 = vadd.xlane.f32.xlu1 %v1224_v42 }
 0x34f   :  { %v1244_v28 = vsel %vm1221_vm14, %v1208_v43, 0.0 }
 0x352   :  { %v1205_v44 = vpop.xlane.xlu0 %1204  ;;  %v1211_v45 = vpop.xlane.xlu1 %1210 }
 0x353   :  { %v1243_v46 = vsel %vm1221_vm14, %v1205_v44, 0.0  ;;  %v1264_v39 = vsel %vm1221_vm14, %v1211_v45, 0.0 }
 0x354   :  { %v1245_v30 = vadd.f32 %v1244_v28, %v1243_v46 }
 0x356   :  { %v1214_v47 = vpop.xlane.xlu0 %1213  ;;  %1246 = vadd.xlane.f32.xlu0 %v1245_v30  ;;  %v1217_v48 = vpop.xlane.xlu1 %1216 }
 0x357   :  { %v1265_v50 = vsel %vm1221_vm14, %v1214_v47, 0.0  ;;  %v1285_v7 = vsel %vm1221_vm14, %v1217_v48, 0.0 }
 0x358   :  { %v1266_v49 = vadd.f32 %v1265_v50, %v1264_v39 }
 0x35a   :  { %v1220_v4 = vpop.xlane.xlu0 %1219  ;;  %1267 = vadd.xlane.f32.xlu1 %v1266_v49 }
 0x35b   :  { %v1286_v36 = vsel %vm1221_vm14, %v1220_v4, 0.0 }
 0x35c   :  { %v1287_v51 = vadd.f32 %v1286_v36, %v1285_v7 }
 0x35e   :  { %1288 = vadd.xlane.f32.xlu0 %v1287_v51 }
 0x390   :  { %v1080_v52 = vpop.f32.mrb[20].mxu1 }
 0x391   :  { %v1728_v53 = vpop.f32.mrb[21].mxu1  ;;  %1754 = vmatmul.mubr.msk.f32.vlgmr.msra.gmra.mrb[16].mxu0 %vm1315_vm10, %v1080_v52 }
 0x3db   :  { %v1226_v54 = vpop.xlane.xlu1 %1225 }
 0x3dc   :  { %v1227_v55 = vrot.slane %v1226_v54, 4 }
 0x3de   :  { %v1228_v56 = vadd.f32 %v1227_v55, %v1226_v54 }
 0x3e0   :  { %v1229_v57 = vrot.slane %v1228_v56, 2 }
 0x3e2   :  { %v1230_v58 = vadd.f32 %v1229_v57, %v1228_v56 }
 0x3e3   :  { %v1247_v59 = vpop.xlane.xlu0 %1246 }
 0x3e4   :  { %v1248_v60 = vrot.slane %v1247_v59, 4  ;;  %v1231_v61 = vrot.slane %v1230_v58, 1 }
 0x3e6   :  { %v1249_v62 = vadd.f32 %v1248_v60, %v1247_v59  ;;  %v1232_v63 = vadd.f32 %v1231_v61, %v1230_v58 }
 0x3e7   :  { %v1268_v0 = vpop.xlane.xlu1 %1267 }
 0x3e8   :  { %v1250_v1 = vrot.slane %v1249_v62, 2  ;;  %v1269_v35 = vrot.slane %v1268_v0, 4  ;;  %1847 = vpush %v1232_v63 }
 0x3ea   :  { %v1270_v2 = vadd.f32 %v1269_v35, %v1268_v0  ;;  %v1251_v3 = vadd.f32 %v1250_v1, %v1249_v62 }
 0x3eb   :  { %v1289_v5 = vpop.xlane.xlu0 %1288 }
 0x3ec   :  { %v1271_v6 = vrot.slane %v1270_v2, 2  ;;  %v1290_v8 = vrot.slane %v1289_v5, 4  ;;  %v1252_v9 = vrot.slane %v1251_v3, 1 }
 0x3ee   :  { %v1272_v10 = vadd.f32 %v1271_v6, %v1270_v2  ;;  %v1291_v11 = vadd.f32 %v1290_v8, %v1289_v5  ;;  %v1253_v12 = vadd.f32 %v1252_v9, %v1251_v3 }
 0x3f0   :  { %v1292_v13 = vrot.slane %v1291_v11, 2  ;;  %1849 = vpush %v1253_v12  ;;  %v1273_v14 = vrot.slane %v1272_v10, 1 }
 0x3f2   :  { %v1293_v15 = vadd.f32 %v1292_v13, %v1291_v11  ;;  %v1274_v16 = vadd.f32 %v1273_v14, %v1272_v10 }
 0x3f4   :  { %1851 = vpush %v1274_v16  ;;  %v1294_v17 = vrot.slane %v1293_v15, 1 }
 0x3f6   :  { %v1295_v18 = vadd.f32 %v1294_v17, %v1293_v15 }
 0x3f8   :  { %1853 = vpush %v1295_v18 }
 0x419   :  { %s1848_s2 = spop %1847 }
 0x41a   :  { %v1234_v20 = vstv %s1848_s2 }
 0x41b   :  { %vm1237_vm2 = vcmp.eq.f32.partialorder %v1234_v20, inf  ;;  %v1240_v41 = vand.u32 2147483648, %v1234_v20  ;;  %vm1239_vm9 = vcmp.eq.f32.partialorder %v1234_v20, 0.0 }
 0x421   :  { %s1850_s3 = spop %1849 }
 0x422   :  { %v1255_v19 = vstv %s1850_s3 }
 0x423   :  { %1863 = vrsqrt.f32 %v1255_v19  ;;  %vm1258_vm15 = vcmp.eq.f32.partialorder %v1255_v19, inf  ;;  %v1261_v37 = vand.u32 2147483648, %v1255_v19  ;;  %vm1260_vm5 = vcmp.eq.f32.partialorder %v1255_v19, 0.0 }
 0x424   :  { %1865 = vrsqrt.f32 %v1234_v20 }
 0x425   :  { %s1852_s4 = spop %1851 }
 0x426   :  { %v1276_v21 = vstv %s1852_s4 }
 0x427   :  { %1867 = vrsqrt.f32 %v1276_v21  ;;  %vm1279_vm3 = vcmp.eq.f32.partialorder %v1276_v21, inf  ;;  %v1282_v42 = vand.u32 2147483648, %v1276_v21  ;;  %vm1281_vm7 = vcmp.eq.f32.partialorder %v1276_v21, 0.0 }
 0x429   :  { %s1854_s11 = spop %1853 }
 0x42a   :  { %v1297_v22 = vstv %s1854_s11 }
 0x42b   :  { %1869 = vrsqrt.f32 %v1297_v22  ;;  %vm1300_vm6 = vcmp.eq.f32.partialorder %v1297_v22, inf  ;;  %v1303_v45 = vand.u32 2147483648, %v1297_v22  ;;  %vm1302_vm11 = vcmp.eq.f32.partialorder %v1297_v22, 0.0 }
 0x42d   :  { %v1864_v23 = vpop.eup %1863 }
 0x42e   :  { %v1866_v24 = vpop.eup %1865  ;;  %v1257_v26 = vmul.f32 %v1864_v23, %v1255_v19 }
 0x42f   :  { %v1236_v31 = vmul.f32 %v1866_v24, %v1234_v20 }
 0x430   :  { %v1259_v33 = vsel %vm1258_vm15, %v1255_v19, %v1257_v26 }
 0x431   :  { %v1868_v25 = vpop.eup %1867  ;;  %v1238_v38 = vsel %vm1237_vm2, %v1234_v20, %v1236_v31  ;;  %v1262_v43 = vsel %vm1260_vm5, %v1261_v37, %v1259_v33 }
 0x432   :  { %v1278_v32 = vmul.f32 %v1868_v25, %v1276_v21  ;;  %v1241_v28 = vsel %vm1239_vm9, %v1240_v41, %v1238_v38 }
 0x433   :  { %v1263_v30 = vadd.f32 %v1262_v43, %v1241_v28 }
 0x434   :  { %v1280_v40 = vsel %vm1279_vm3, %v1276_v21, %v1278_v32 }
 0x435   :  { %v1870_v29 = vpop.eup %1869  ;;  %v1283_v46 = vsel %vm1281_vm7, %v1282_v42, %v1280_v40 }
 0x436   :  { %v1299_v34 = vmul.f32 %v1870_v29, %v1297_v22  ;;  %v1284_v39 = vadd.f32 %v1283_v46, %v1263_v30 }
 0x438   :  { %v1301_v44 = vsel %vm1300_vm6, %v1297_v22, %v1299_v34 }
 0x439   :  { %v1304_v47 = vsel %vm1302_vm11, %v1303_v45, %v1301_v44 }
 0x43a   :  { %v1305_v50 = vadd.f32 %v1304_v47, %v1284_v39 }
 0x43c   :  { %v1306_v48 = vmul.f32 0.01, %v1305_v50 }
 0x43e   :  { %v1314_v49 = vsel %vm1313_vm13, %v1306_v48, 0.0 }
 0x464   :  { %v1385_v4 = vpop.f32.mrb[16].mxu0 }
 0x465   :  { %v1386_v7 = vadd.f32 %v1385_v4, %v1314_v49  ;;  %v1755_v36 = vpop.f32.mrb[17].mxu0 }
 0x467   :  { %1389 = vst [vmem:[%s2266_s5] sm:$0x1] %v1386_v7 }

</bundles_post_ra>
